<compile_context>
chip_gen: v5e
topology: v5e:2x2
jax: 0.10.0
libtpu: 0.0.40
codegen_flags: <defaults>
</compile_context>

<pallas_src>
import jax
import jax.numpy as jnp
from jax.experimental import pallas as pl
from jax.experimental.pallas import tpu as pltpu


def mlp_kernel(x_ref, w1_ref, b1_ref, w2_ref, b2_ref, w3_ref, b3_ref,
               w4_ref, b4_ref, o_ref):
    # x_ref: [2, Bt] (batch on lanes), possibly bf16 -> upcast for VPU math.
    xT = x_ref[...].astype(jnp.float32)
    w1 = w1_ref[...]                                           # [dim, 2] f32

    # Layer 1: Linear(2, dim) + ReLU.  K=2 -> two VPU broadcast FMAs
    # (outer products) in f32 instead of an MXU matmul.
    h = w1[:, 0:1] * xT[0:1, :] + w1[:, 1:2] * xT[1:2, :]      # [dim, Bt]
    h = jnp.maximum(h + b1_ref[...], 0.0)

    mxu_dtype = w2_ref.dtype   # bf16 (single-pass MXU) or f32

    # Layer 2: Linear(dim, dim) + ReLU  (MXU, lane-dense N = Bt, f32 accum).
    h = jnp.dot(w2_ref[...], h.astype(mxu_dtype),
                preferred_element_type=jnp.float32)
    h = jnp.maximum(h + b2_ref[...], 0.0)

    # Layer 3: Linear(dim, dim) + ReLU.
    h = jnp.dot(w3_ref[...], h.astype(mxu_dtype),
                preferred_element_type=jnp.float32)
    h = jnp.maximum(h + b3_ref[...], 0.0)

    # Layer 4: Linear(dim, 1) on VPU/XLU -- an M=1, K=dim MXU matmul would
    # waste a weight push + result drain per tile.
    o = jnp.sum(w4_ref[...] * h, axis=0, keepdims=True)        # [1, Bt] f32
    o_ref[...] = (o + b4_ref[0, 0]).astype(o_ref.dtype)


def _round_up(a, m):
    return ((a + m - 1) // m) * m


def discriminator_forward(x, params, *, block_n=8192,
                          compute_dtype=jnp.bfloat16):
    """Pallas Discriminator.forward.  x: [B, 2] f32 -> [B, 1] f32.

    Batch maps to lanes; activations are [dim, block_n].  Weights/biases use
    a constant index_map so they stay resident across batch tiles.  x and the
    dim x dim weights are moved in `compute_dtype` (default bf16, f32 accum);
    pass compute_dtype=jnp.float32 for a full-precision path.
    """
    w1, b1, w2, b2, w3, b3, w4, b4 = params   # PyTorch layout W:[out,in], b:[out,1]
    B, in_dim = x.shape
    dim = w1.shape[0]
    lane = 128

    # --- tiling: big lane-dense batch tiles; >=2 tiles for large batches so
    # the "parallel" grid axis can shard across v7x's two TensorCores.
    block_n = max(lane, (block_n // lane) * lane)
    Bp = _round_up(B, lane)
    block_n = min(block_n, Bp)
    if Bp >= 2 * 4096:
        block_n = min(block_n, max(lane, (Bp // 2) // lane * lane))
    Bp = _round_up(Bp, block_n)
    grid_n = Bp // block_n

    # --- build the padded, transposed, cast input in ONE op (single HBM pass).
    xT = jnp.zeros((in_dim, Bp), compute_dtype).at[:, :B].set(
        x.T.astype(compute_dtype))

    # --- params: dim x dim weights in compute_dtype; small tensors stay f32.
    w1f = w1.astype(jnp.float32)
    w2c = w2.astype(compute_dtype)
    w3c = w3.astype(compute_dtype)
    w4_col = w4.T.astype(jnp.float32)            # [dim, 1]
    b1f = b1.astype(jnp.float32)
    b2f = b2.astype(jnp.float32)
    b3f = b3.astype(jnp.float32)
    b4s = b4.reshape(1, 1).astype(jnp.float32)   # SMEM scalar

    # --- VMEM budget: 2x buffered x/out tiles + resident weights + f32 temps.
    itemsize = jnp.dtype(compute_dtype).itemsize
    weight_bytes = sum(int(p.size) * 4 for p in (w1, b1, w2, b2, w3, b3, w4))
    est = (2 * in_dim * block_n * itemsize
           + 2 * block_n * 4
           + 2 * weight_bytes
           + 6 * dim * block_n * 4
           + (4 << 20))
    vmem_limit = int(min(64 << 20, max(est, 16 << 20)))

    # Resident constants (constant index_map -> fetched once, revisited).
    # TODO(synk): for large args.dim add pipeline_mode=pl.Buffered(1) here to
    # avoid double-buffering the dim x dim weights in VMEM.
    resident = lambda shape: pl.BlockSpec(shape, lambda i: (0, 0))

    outT = pl.pallas_call(
        mlp_kernel,
        out_shape=jax.ShapeDtypeStruct((1, Bp), jnp.float32),
        grid_spec=pltpu.PrefetchScalarGridSpec(
            num_scalar_prefetch=0,
            grid=(grid_n,),
            in_specs=[
                pl.BlockSpec((in_dim, block_n), lambda i: (0, i)),  # xT tile
                resident((dim, in_dim)),                            # w1 (f32)
                resident((dim, 1)),                                 # b1
                resident((dim, dim)),                               # w2 (bf16)
                resident((dim, 1)),                                 # b2
                resident((dim, dim)),                               # w3 (bf16)
                resident((dim, 1)),                                 # b3
                resident((dim, 1)),                                 # w4 column (f32)
                pl.BlockSpec(memory_space=pltpu.MemorySpace.SMEM),  # b4 scalar
            ],
            out_specs=pl.BlockSpec((1, block_n), lambda i: (0, i)),
        ),
        compiler_params=pltpu.CompilerParams(
            dimension_semantics=("parallel",),
            vmem_limit_bytes=vmem_limit),
    )(xT, w1f, b1f, w2c, b2f, w3c, b3f, w4_col, b4s)

    # Drop padding, return [B, 1] like the PyTorch module ([1,B].T is layout-free).
    return outT[:, :B].T


def init_params(key, dim):
    """nn.Linear-style init (uniform +-1/sqrt(fan_in)), PyTorch layout:
    W:[out_features, in_features], b stored as a column [out_features, 1]."""
    def linear(k, fan_in, fan_out):
        kw, kb = jax.random.split(k)
        bound = 1.0 / jnp.sqrt(fan_in)
        w = jax.random.uniform(kw, (fan_out, fan_in), jnp.float32, -bound, bound)
        b = jax.random.uniform(kb, (fan_out, 1), jnp.float32, -bound, bound)
        return w, b

    k1, k2, k3, k4 = jax.random.split(key, 4)
    w1, b1 = linear(k1, 2, dim)
    w2, b2 = linear(k2, dim, dim)
    w3, b3 = linear(k3, dim, dim)
    w4, b4 = linear(k4, dim, 1)
    return (w1, b1, w2, b2, w3, b3, w4, b4)


def reference_forward(x, params):
    w1, b1, w2, b2, w3, b3, w4, b4 = params
    h = jnp.maximum(x @ w1.T + b1.T, 0.0)
    h = jnp.maximum(h @ w2.T + b2.T, 0.0)
    h = jnp.maximum(h @ w3.T + b3.T, 0.0)
    return h @ w4.T + b4.T


if __name__ == "__main__":
    key = jax.random.PRNGKey(0)
    kx, kp = jax.random.split(key)

    dim = 32        # args.dim
    batch = 16      # arbitrary batch; wrapper pads to a lane-dense tile
    x = jax.random.normal(kx, (batch, 2), dtype=jnp.float32)
    params = init_params(kp, dim)

    ref = reference_forward(x, params)

    # Full-precision path: tight check against the f32 reference.
    out_f32 = jax.block_until_ready(
        discriminator_forward(x, params, compute_dtype=jnp.float32))
    assert out_f32.shape == (batch, 1)
    assert jnp.allclose(out_f32, ref, atol=1e-4, rtol=1e-4), "f32 mismatch"

    # Default (bf16 data movement, f32 accumulation) path: loose check.
    out_bf16 = jax.block_until_ready(discriminator_forward(x, params))
    assert out_bf16.shape == (batch, 1)
    assert jnp.allclose(out_bf16, ref, atol=5e-2, rtol=5e-2), "bf16 mismatch"

    print("KERNEL_OK")
</pallas_src>

<mosaic_0001>
module attributes {stable_mosaic.version = 11 : i64} {
  func.func @mlp_kernel(%arg0: i32, %arg1: memref<2x128xf32, #tpu.memory_space<vmem>>, %arg2: memref<32x2xf32, #tpu.memory_space<vmem>>, %arg3: memref<32x1xf32, #tpu.memory_space<vmem>>, %arg4: memref<32x32xf32, #tpu.memory_space<vmem>>, %arg5: memref<32x1xf32, #tpu.memory_space<vmem>>, %arg6: memref<32x32xf32, #tpu.memory_space<vmem>>, %arg7: memref<32x1xf32, #tpu.memory_space<vmem>>, %arg8: memref<32x1xf32, #tpu.memory_space<vmem>>, %arg9: memref<1x1xf32, #tpu.memory_space<smem>>, %arg10: memref<1x128xf32, #tpu.memory_space<vmem>>) attributes {dimension_semantics = [#tpu.dimension_semantics<parallel>], iteration_bounds = array<i64: 1>, scalar_prefetch = 0 : i64, scratch_operands = 0 : i64, tpu.core_type = #tpu.core_type<tc>, window_params = [{transform_indices = @transform_0, window_bounds = array<i64: 2, 128>}, {pipeline_mode = #tpu.pipeline_mode<synchronous>, transform_indices = @transform_1, window_bounds = array<i64: 32, 2>}, {pipeline_mode = #tpu.pipeline_mode<synchronous>, transform_indices = @transform_2, window_bounds = array<i64: 32, 1>}, {pipeline_mode = #tpu.pipeline_mode<synchronous>, transform_indices = @transform_3, window_bounds = array<i64: 32, 32>}, {pipeline_mode = #tpu.pipeline_mode<synchronous>, transform_indices = @transform_4, window_bounds = array<i64: 32, 1>}, {pipeline_mode = #tpu.pipeline_mode<synchronous>, transform_indices = @transform_5, window_bounds = array<i64: 32, 32>}, {pipeline_mode = #tpu.pipeline_mode<synchronous>, transform_indices = @transform_6, window_bounds = array<i64: 32, 1>}, {pipeline_mode = #tpu.pipeline_mode<synchronous>, transform_indices = @transform_7, window_bounds = array<i64: 32, 1>}, {transform_indices = @transform_8, window_bounds = array<i64: 1, 1>}, {transform_indices = @transform_9, window_bounds = array<i64: 1, 128>}]} {
    %c0 = arith.constant 0 : index
    %c0_0 = arith.constant 0 : index
    %0 = vector.load %arg1[%c0, %c0_0] : memref<2x128xf32, #tpu.memory_space<vmem>>, vector<2x128xf32>
    %c0_1 = arith.constant 0 : index
    %c0_2 = arith.constant 0 : index
    %1 = vector.load %arg2[%c0_1, %c0_2] : memref<32x2xf32, #tpu.memory_space<vmem>>, vector<32x2xf32>
    %2 = vector.extract_strided_slice %1 {offsets = [0, 0], sizes = [32, 1], strides = [1, 1]} : vector<32x2xf32> to vector<32x1xf32>
    %3 = vector.extract_strided_slice %0 {offsets = [0, 0], sizes = [1, 128], strides = [1, 1]} : vector<2x128xf32> to vector<1x128xf32>
    %4 = vector.broadcast %2 : vector<32x1xf32> to vector<32x128xf32>
    %5 = vector.broadcast %3 : vector<1x128xf32> to vector<32x128xf32>
    %6 = arith.mulf %4, %5 : vector<32x128xf32>
    %7 = vector.extract_strided_slice %1 {offsets = [0, 1], sizes = [32, 1], strides = [1, 1]} : vector<32x2xf32> to vector<32x1xf32>
    %8 = vector.extract_strided_slice %0 {offsets = [1, 0], sizes = [1, 128], strides = [1, 1]} : vector<2x128xf32> to vector<1x128xf32>
    %9 = vector.broadcast %7 : vector<32x1xf32> to vector<32x128xf32>
    %10 = vector.broadcast %8 : vector<1x128xf32> to vector<32x128xf32>
    %11 = arith.mulf %9, %10 : vector<32x128xf32>
    %12 = arith.addf %6, %11 : vector<32x128xf32>
    %c0_3 = arith.constant 0 : index
    %c0_4 = arith.constant 0 : index
    %13 = vector.load %arg3[%c0_3, %c0_4] : memref<32x1xf32, #tpu.memory_space<vmem>>, vector<32x1xf32>
    %14 = vector.broadcast %13 : vector<32x1xf32> to vector<32x128xf32>
    %15 = arith.addf %12, %14 : vector<32x128xf32>
    %cst = arith.constant 0.000000e+00 : f32
    %16 = vector.broadcast %cst : f32 to vector<32x128xf32>
    %17 = arith.maximumf %15, %16 : vector<32x128xf32>
    %c0_5 = arith.constant 0 : index
    %c0_6 = arith.constant 0 : index
    %18 = vector.load %arg4[%c0_5, %c0_6] : memref<32x32xf32, #tpu.memory_space<vmem>>, vector<32x32xf32>
    %cst_7 = arith.constant dense<0.000000e+00> : vector<32x128xf32>
    %19 = tpu.matmul %18, %17, %cst_7 {dimension_numbers = #tpu.dot_dimension_numbers<[1], [0], [0], [1], [0, 0, 1, 1], [], []>} : vector<32x32xf32>, vector<32x128xf32>, vector<32x128xf32> -> vector<32x128xf32>
    %c0_8 = arith.constant 0 : index
    %c0_9 = arith.constant 0 : index
    %20 = vector.load %arg5[%c0_8, %c0_9] : memref<32x1xf32, #tpu.memory_space<vmem>>, vector<32x1xf32>
    %21 = vector.broadcast %20 : vector<32x1xf32> to vector<32x128xf32>
    %22 = arith.addf %19, %21 : vector<32x128xf32>
    %cst_10 = arith.constant 0.000000e+00 : f32
    %23 = vector.broadcast %cst_10 : f32 to vector<32x128xf32>
    %24 = arith.maximumf %22, %23 : vector<32x128xf32>
    %c0_11 = arith.constant 0 : index
    %c0_12 = arith.constant 0 : index
    %25 = vector.load %arg6[%c0_11, %c0_12] : memref<32x32xf32, #tpu.memory_space<vmem>>, vector<32x32xf32>
    %cst_13 = arith.constant dense<0.000000e+00> : vector<32x128xf32>
    %26 = tpu.matmul %25, %24, %cst_13 {dimension_numbers = #tpu.dot_dimension_numbers<[1], [0], [0], [1], [0, 0, 1, 1], [], []>} : vector<32x32xf32>, vector<32x128xf32>, vector<32x128xf32> -> vector<32x128xf32>
    %c0_14 = arith.constant 0 : index
    %c0_15 = arith.constant 0 : index
    %27 = vector.load %arg7[%c0_14, %c0_15] : memref<32x1xf32, #tpu.memory_space<vmem>>, vector<32x1xf32>
    %28 = vector.broadcast %27 : vector<32x1xf32> to vector<32x128xf32>
    %29 = arith.addf %26, %28 : vector<32x128xf32>
    %cst_16 = arith.constant 0.000000e+00 : f32
    %30 = vector.broadcast %cst_16 : f32 to vector<32x128xf32>
    %31 = arith.maximumf %29, %30 : vector<32x128xf32>
    %c0_17 = arith.constant 0 : index
    %c0_18 = arith.constant 0 : index
    %32 = vector.load %arg8[%c0_17, %c0_18] : memref<32x1xf32, #tpu.memory_space<vmem>>, vector<32x1xf32>
    %33 = vector.broadcast %32 : vector<32x1xf32> to vector<32x128xf32>
    %34 = arith.mulf %33, %31 : vector<32x128xf32>
    %cst_19 = arith.constant dense<0.000000e+00> : vector<128xf32>
    %35 = vector.multi_reduction <add>, %34, %cst_19 [0] : vector<32x128xf32> to vector<128xf32>
    %36 = vector.shape_cast %35 : vector<128xf32> to vector<1x128xf32>
    %c0_20 = arith.constant 0 : index
    %c0_21 = arith.constant 0 : index
    %37 = memref.load %arg9[%c0_20, %c0_21] : memref<1x1xf32, #tpu.memory_space<smem>>
    %38 = vector.broadcast %37 : f32 to vector<1x128xf32>
    %39 = arith.addf %36, %38 : vector<1x128xf32>
    %c0_22 = arith.constant 0 : index
    %c0_23 = arith.constant 0 : index
    %40 = vector.load %arg10[%c0_22, %c0_23] : memref<1x128xf32, #tpu.memory_space<vmem>>, vector<1x128xf32>
    tpu.vector_store %arg10[%c0_22, %c0_23], %39 {strides = array<i32>} : memref<1x128xf32, #tpu.memory_space<vmem>>, vector<1x128xf32>,
    return
  }
  func.func @transform_0(%arg0: i32) -> (i32, i32) {
    %c0_i32 = arith.constant 0 : i32
    %c0_i32_0 = arith.constant 0 : i32
    return %c0_i32, %arg0 : i32, i32
  }
  func.func @transform_1(%arg0: i32) -> (i32, i32) {
    %c0_i32 = arith.constant 0 : i32
    %c0_i32_0 = arith.constant 0 : i32
    %c0_i32_1 = arith.constant 0 : i32
    return %c0_i32, %c0_i32_0 : i32, i32
  }
  func.func @transform_2(%arg0: i32) -> (i32, i32) {
    %c0_i32 = arith.constant 0 : i32
    %c0_i32_0 = arith.constant 0 : i32
    %c0_i32_1 = arith.constant 0 : i32
    return %c0_i32, %c0_i32_0 : i32, i32
  }
  func.func @transform_3(%arg0: i32) -> (i32, i32) {
    %c0_i32 = arith.constant 0 : i32
    %c0_i32_0 = arith.constant 0 : i32
    %c0_i32_1 = arith.constant 0 : i32
    return %c0_i32, %c0_i32_0 : i32, i32
  }
  func.func @transform_4(%arg0: i32) -> (i32, i32) {
    %c0_i32 = arith.constant 0 : i32
    %c0_i32_0 = arith.constant 0 : i32
    %c0_i32_1 = arith.constant 0 : i32
    return %c0_i32, %c0_i32_0 : i32, i32
  }
  func.func @transform_5(%arg0: i32) -> (i32, i32) {
    %c0_i32 = arith.constant 0 : i32
    %c0_i32_0 = arith.constant 0 : i32
    %c0_i32_1 = arith.constant 0 : i32
    return %c0_i32, %c0_i32_0 : i32, i32
  }
  func.func @transform_6(%arg0: i32) -> (i32, i32) {
    %c0_i32 = arith.constant 0 : i32
    %c0_i32_0 = arith.constant 0 : i32
    %c0_i32_1 = arith.constant 0 : i32
    return %c0_i32, %c0_i32_0 : i32, i32
  }
  func.func @transform_7(%arg0: i32) -> (i32, i32) {
    %c0_i32 = arith.constant 0 : i32
    %c0_i32_0 = arith.constant 0 : i32
    %c0_i32_1 = arith.constant 0 : i32
    return %c0_i32, %c0_i32_0 : i32, i32
  }
  func.func @transform_8(%arg0: i32) -> (i32, i32) {
    %c0_i32 = arith.constant 0 : i32
    %c0_i32_0 = arith.constant 0 : i32
    %c0_i32_1 = arith.constant 0 : i32
    return %c0_i32, %c0_i32_0 : i32, i32
  }
  func.func @transform_9(%arg0: i32) -> (i32, i32) {
    %c0_i32 = arith.constant 0 : i32
    %c0_i32_0 = arith.constant 0 : i32
    return %c0_i32, %arg0 : i32, i32
  }
}

</mosaic_0001>

<bundles_post_ra>
// kernel: tpu_custom_call.1
= control target key start
LH: loop header
LB: loop body
LE: loop exit
PB: predicated region body
PF: predicated region fallthrough
CT: control target
= control target key end

     0   :  { %v379_v3 = vmov 0   ;;  %s533_s0 = inlined_call_operand.vmem [shape: f32[2,128], index: 0, kind: input, shape index: {}]   ;;  %s534_s1 = inlined_call_operand.vmem [shape: f32[32,2], index: 1, kind: input, shape index: {}]   ;;  %s535_s2 = inlined_call_operand.vmem [shape: f32[32,1], index: 2, kind: input, shape index: {}]   ;;  %s536_s3 = inlined_call_operand.vmem [shape: f32[32,32], index: 3, kind: input, shape index: {}]   ;;  %s537_s4 = inlined_call_operand.vmem [shape: f32[32,1], index: 4, kind: input, shape index: {}]   ;;  %s538_s5 = inlined_call_operand.vmem [shape: f32[32,32], index: 5, kind: input, shape index: {}]   ;;  %s539_s6 = inlined_call_operand.vmem [shape: f32[32,1], index: 6, kind: input, shape index: {}]   ;;  %s540_s7 = inlined_call_operand.vmem [shape: f32[32,1], index: 7, kind: input, shape index: {}]   ;;  %s541_s8 = inlined_call_operand.<no memory space> [shape: f32[1,1], index: 8, kind: input, shape index: {}]   ;;  %s542_s9 = inlined_call_operand.hbm [shape: f32[1,128], index: 9, kind: output, shape index: {}]  }
   0x1   :  { %v38_v0 = vld [vmem:[%s534_s1 + $0x18] sm:$0xff]  ;;  %v37_v1 = vld [vmem:[%s534_s1 + $0x10] sm:$0xff]  ;;  %v36_v2 = vld [vmem:[%s534_s1 + $0x8] sm:$0xff]  ;;  %348 = vset.pattern.permute.xlu2 %v379_v3  ;;  %346 = vset.pattern.permute.xlu1 %v379_v3 }
   0x2   :  { %344 = vset.pattern.permute.xlu0 %v379_v3  ;;  %51 = vperm.xlu1 %346, %v37_v1  }
   0x3   :  { %56 = vperm.xlu0 %344, %v38_v0   ;;  %46 = vperm.xlu2 %348, %v36_v2  }
   0x4   :  { %15 = vsyncpa [#allocation4], 0  ;;  %v380_v4 = vmov 1   ;;  %v35_v5 = vld [vmem:[%s534_s1] sm:$0xff]  ;;  %v92_v6 = vld [vmem:[%s535_s2 + $0x18] sm:$0xff]  ;;  %vm149_vm0 = vcmask 261120  }
   0x5   :  { %v91_v7 = vld [vmem:[%s535_s2 + $0x10] sm:$0xff]  ;;  %v89_v8 = vld [vmem:[%s535_s2] sm:$0xff]  ;;  %v90_v9 = vld [vmem:[%s535_s2 + $0x8] sm:$0xff]  ;;  %s381_s17 = smov [#allocation3]  }
   0x6   :  { %v128_v10 = vld [vmem:[%s537_s4 + $0x18] sm:$0xff]  ;;  %v199_v11 = vld [vmem:[%s539_s6] sm:$0xff]  ;;  %v127_v12 = vld [vmem:[%s537_s4 + $0x10] sm:$0xff]  ;;  %s314_s18 = sshll.u32 %s381_s17, 4  ;;  %s315_s18 = int_to_ptr.vmem [resolvable:$true] %s314_s18 }
   0x7   :  { %v126_v13 = vld [vmem:[%s537_s4 + $0x8] sm:$0xff]  ;;  %v202_v14 = vld [vmem:[%s539_s6 + $0x18] sm:$0xff]  ;;  %v125_v15 = vld [vmem:[%s537_s4] sm:$0xff]  ;;  %s316_s4 = sshll.u32 %s542_s9, 4  ;;  %s317_s4 = int_to_ptr.hbm [resolvable:$true] %s316_s4 }
   0x8   :  { %v200_v16 = vld [vmem:[%s539_s6 + $0x8] sm:$0xff]  ;;  %v270_v17 = vld [vmem:[%s540_s7 + $0x10] sm:$0xff]  ;;  %v268_v19 = vld [vmem:[%s540_s7] sm:$0xff] }
   0x9   :  { %v201_v18 = vld [vmem:[%s539_s6 + $0x10] sm:$0xff]  ;;  %v269_v20 = vld [vmem:[%s540_s7 + $0x8] sm:$0xff]  ;;  %v271_v21 = vld [vmem:[%s540_s7 + $0x18] sm:$0xff] }
   0xa   :  { %347 = vset.pattern.permute.xlu1 %v380_v4  ;;  %v34_v28 = vld [vmem:[%s533_s0] sm:$0x3]  ;;  %v123_v58 = vld [vmem:[%s536_s3 + $0x10] sm:$0xff]  ;;  %v122_v59 = vld [vmem:[%s536_s3 + $0x8] sm:$0xff] }
   0xb   :  { %345 = vset.pattern.permute.xlu0 %v380_v4  ;;  %349 = vset.pattern.permute.xlu2 %v380_v4  ;;  %v80_v29 = vperm.slane %v34_v28, 1  ;;  %v59_v30 = vperm.slane %v34_v28, 0  ;;  %v121_v57 = vld [vmem:[%s536_s3] sm:$0xff]  ;;  %v124_v60 = vld [vmem:[%s536_s3 + $0x18] sm:$0xff] }
   0xc   :  { %77 = vperm.xlu0 %345, %v38_v0   ;;  %73 = vperm.xlu1 %347, %v37_v1  }
   0xd   :  { %69 = vperm.xlu2 %349, %v36_v2  }
  0x14   :  { %350 = vset.pattern.permute.xlu1 %v379_v3  ;;  %65 = vperm.xlu0 %345, %v35_v5  }
  0x15   :  { %351 = vset.pattern.permute.xlu2 %v379_v3  ;;  %110 = vperm.xlu1 %350, %v92_v6  }
  0x16   :  { %41 = vperm.xlu2 %351, %v35_v5  }
  0x1c   :  { %352 = vset.pattern.permute.xlu0 %v379_v3 }
  0x1d   :  { %105 = vperm.xlu1 %350, %v91_v7   ;;  %95 = vperm.xlu0 %352, %v89_v8  }
  0x1e   :  { %100 = vperm.xlu2 %351, %v90_v9  }
  0x25   :  { %146 = vperm.xlu1 %350, %v128_v10   ;;  %205 = vperm.xlu0 %352, %v199_v11  }
  0x26   :  { %141 = vperm.xlu2 %351, %v127_v12  }
  0x2d   :  { %136 = vperm.xlu1 %350, %v126_v13   ;;  %220 = vperm.xlu0 %352, %v202_v14   ;;  %v195_v13 = vld [vmem:[%s538_s5] sm:$0xff]  ;;  %v197_v14 = vld [vmem:[%s538_s5 + $0x10] sm:$0xff] }
  0x2e   :  { %131 = vperm.xlu2 %351, %v125_v15   ;;  %v196_v15 = vld [vmem:[%s538_s5 + $0x8] sm:$0xff] }
  0x35   :  { %210 = vperm.xlu1 %350, %v200_v16   ;;  %284 = vperm.xlu0 %352, %v270_v17   ;;  %v198_v16 = vld [vmem:[%s538_s5 + $0x18] sm:$0xff] }
  0x36   :  { %215 = vperm.xlu2 %351, %v201_v18  }
  0x3d   :  { %274 = vperm.xlu1 %350, %v268_v19  }
  0x3e   :  { %279 = vperm.xlu2 %351, %v269_v20  }
  0x45   :  { %289 = vperm.xlu1 %350, %v271_v21  }
  0x5d   :  { %v47_v22 = vpop.permute.xlu2 %46 }
  0x5e   :  { %v61_v36 = vmul.f32 %v59_v30, %v47_v22 }
  0x67   :  { %v70_v25 = vpop.permute.xlu2 %69 }
  0x68   :  { %v82_v37 = vmul.f32 %v80_v29, %v70_v25 }
  0x6a   :  { %v86_v42 = vadd.f32 %v82_v37, %v61_v36 }
  0x70   :  { %v42_v32 = vpop.permute.xlu2 %41 }
  0x71   :  { %v60_v43 = vmul.f32 %v59_v30, %v42_v32 }
  0x74   :  { %v52_v23 = vpop.permute.xlu1 %51 }
  0x75   :  { %v57_v24 = vpop.permute.xlu0 %56  ;;  %v62_v44 = vmul.f32 %v59_v30, %v52_v23 }
  0x76   :  { %v63_v33 = vmul.f32 %v59_v30, %v57_v24 }
  0x78   :  { %v101_v46 = vpop.permute.xlu2 %100 }
  0x79   :  { %v114_v50 = vadd.f32 %v101_v46, %v86_v42 }
  0x7b   :  { %v118_v55 = vmax.f32 %v114_v50, 0.0 }
  0x7e   :  { %v78_v26 = vpop.permute.xlu0 %77  ;;  %v74_v27 = vpop.permute.xlu1 %73 }
  0x7f   :  { %v84_v31 = vmul.f32 %v80_v29, %v78_v26  ;;  %v83_v40 = vmul.f32 %v80_v29, %v74_v27 }
  0x80   :  { %v142_v0 = vpop.permute.xlu2 %141 }
  0x81   :  { %v88_v35 = vadd.f32 %v84_v31, %v63_v33  ;;  %v87_v47 = vadd.f32 %v83_v40, %v62_v44 }
  0x86   :  { %v66_v34 = vpop.permute.xlu0 %65 }
  0x87   :  { %v111_v38 = vpop.permute.xlu1 %110  ;;  %v81_v45 = vmul.f32 %v80_v29, %v66_v34 }
  0x88   :  { %v116_v39 = vadd.f32 %v111_v38, %v88_v35  ;;  %v132_v8 = vpop.permute.xlu2 %131 }
  0x89   :  { %v85_v52 = vadd.f32 %v81_v45, %v60_v43 }
  0x8a   :  { %v120_v41 = vmax.f32 %v116_v39, 0.0 }
  0x8c   :  { %174 = vmatpush.msra.mxu0 %v120_v41  ;;  %333 = vmatpush.msra.mxu2 %v120_v41 }
  0x8f   :  { %v106_v48 = vpop.permute.xlu1 %105  ;;  %v96_v49 = vpop.permute.xlu0 %95 }
  0x90   :  { %v115_v51 = vadd.f32 %v106_v48, %v87_v47  ;;  %v113_v54 = vadd.f32 %v96_v49, %v85_v52  ;;  %v216_v20 = vpop.permute.xlu2 %215  ;;  %v306_v49 = vstv %s541_s8 }
  0x92   :  { %v119_v53 = vmax.f32 %v115_v51, 0.0  ;;  %v117_v56 = vmax.f32 %v113_v54, 0.0 }
  0x94   :  { %175 = vmatpush.msra.mxu0 %v119_v53  ;;  %334 = vmatpush.msra.mxu2 %v119_v53 }
  0x96   :  { %176 = vmatpush.msra.mxu0 %v118_v55  ;;  %335 = vmatpush.msra.mxu2 %v118_v55 }
  0x97   :  { %v147_v62 = vpop.permute.xlu1 %146  ;;  %v206_v17 = vpop.permute.xlu0 %205 }
  0x98   :  { %177 = vmatpush.msra.mxu0 %v117_v56  ;;  %336 = vmatpush.msra.mxu2 %v117_v56  ;;  %v280_v30 = vpop.permute.xlu2 %279 }
  0x99   :  { %325 = vmatmul.msk.f32.vlgmr.msra.gmra.mxu0 %vm149_vm0, %v121_v57  ;;  %327 = vmatmul.msk.f32.vlgmr.msra.gmra.mxu2 %vm149_vm0, %v123_v58 }
  0x9f   :  { %v137_v5 = vpop.permute.xlu1 %136  ;;  %v221_v22 = vpop.permute.xlu0 %220 }
  0xa1   :  { %326 = vmatmul.msk.f32.gmra.mxu0 %vm149_vm0, %v122_v59  ;;  %328 = vmatmul.msk.f32.gmra.mxu2 %vm149_vm0, %v124_v60 }
  0xa7   :  { %v211_v18 = vpop.permute.xlu1 %210  ;;  %v285_v37 = vpop.permute.xlu0 %284 }
  0xaf   :  { %v275_v24 = vpop.permute.xlu1 %274 }
  0xb7   :  { %v290_v40 = vpop.permute.xlu1 %289 }
 0x116   :  { %v179_v61 = vpop.f32.mrf.mxu0 }
 0x117   :  { %v180_v9 = vadd.f32 %v179_v61, %v132_v8 }
 0x119   :  { %v191_v12 = vmax.f32 %v180_v9, 0.0 }
 0x11c   :  { %v185_v63 = vpop.f32.mrf.mxu2 }
 0x11d   :  { %v186_v3 = vadd.f32 %v185_v63, %v142_v0 }
 0x11e   :  { %v182_v1 = vpop.f32.mrf.mxu0 }
 0x11f   :  { %v183_v6 = vadd.f32 %v182_v1, %v137_v5  ;;  %v193_v10 = vmax.f32 %v186_v3, 0.0 }
 0x121   :  { %v192_v11 = vmax.f32 %v183_v6, 0.0 }
 0x124   :  { %v188_v2 = vpop.f32.mrf.mxu2 }
 0x125   :  { %v189_v4 = vadd.f32 %v188_v2, %v147_v62 }
 0x127   :  { %v194_v7 = vmax.f32 %v189_v4, 0.0 }
 0x129   :  { %247 = vmatpush.msra.mxu1 %v194_v7  ;;  %337 = vmatpush.msra.mxu3 %v194_v7 }
 0x12b   :  { %248 = vmatpush.msra.mxu1 %v193_v10  ;;  %338 = vmatpush.msra.mxu3 %v193_v10 }
 0x12d   :  { %249 = vmatpush.msra.mxu1 %v192_v11  ;;  %339 = vmatpush.msra.mxu3 %v192_v11 }
 0x12f   :  { %250 = vmatpush.msra.mxu1 %v191_v12  ;;  %340 = vmatpush.msra.mxu3 %v191_v12 }
 0x130   :  { %329 = vmatmul.msk.f32.vlgmr.msra.gmra.mxu1 %vm149_vm0, %v195_v13  ;;  %331 = vmatmul.msk.f32.vlgmr.msra.gmra.mxu3 %vm149_vm0, %v197_v14 }
 0x138   :  { %330 = vmatmul.msk.f32.gmra.mxu1 %vm149_vm0, %v196_v15  ;;  %332 = vmatmul.msk.f32.gmra.mxu3 %vm149_vm0, %v198_v16 }
 0x1ad   :  { %v252_v19 = vpop.f32.mrf.mxu1 }
 0x1ae   :  { %v253_v21 = vadd.f32 %v252_v19, %v206_v17 }
 0x1b0   :  { %v264_v26 = vmax.f32 %v253_v21, 0.0 }
 0x1b2   :  { %v292_v31 = vmul.f32 %v275_v24, %v264_v26 }
 0x1b3   :  { %v258_v23 = vpop.f32.mrf.mxu3 }
 0x1b4   :  { %v259_v27 = vadd.f32 %v258_v23, %v216_v20 }
 0x1b5   :  { %v255_v25 = vpop.f32.mrf.mxu1 }
 0x1b6   :  { %v256_v28 = vadd.f32 %v255_v25, %v211_v18  ;;  %v266_v32 = vmax.f32 %v259_v27, 0.0 }
 0x1b8   :  { %v265_v29 = vmax.f32 %v256_v28, 0.0  ;;  %v294_v38 = vmul.f32 %v285_v37, %v266_v32 }
 0x1ba   :  { %v293_v33 = vmul.f32 %v280_v30, %v265_v29 }
 0x1bb   :  { %v261_v34 = vpop.f32.mrf.mxu3 }
 0x1bc   :  { %v296_v35 = vadd.f32 %v293_v33, %v292_v31  ;;  %v262_v36 = vadd.f32 %v261_v34, %v221_v22 }
 0x1be   :  { %v267_v39 = vmax.f32 %v262_v36, 0.0  ;;  %v297_v42 = vadd.f32 %v296_v35, %v294_v38 }
 0x1c0   :  { %v295_v41 = vmul.f32 %v290_v40, %v267_v39 }
 0x1c2   :  { %v298_v43 = vadd.f32 %v297_v42, %v295_v41 }
 0x1c4   :  { %v299_v44 = vrot.slane %v298_v43, 4 }
 0x1c6   :  { %v300_v45 = vadd.f32 %v299_v44, %v298_v43 }
 0x1c8   :  { %v301_v46 = vrot.slane %v300_v45, 2 }
 0x1ca   :  { %v302_v47 = vadd.f32 %v301_v46, %v300_v45 }
 0x1cc   :  { %v303_v48 = vrot.slane %v302_v47, 1 }
 0x1ce   :  { %v304_v50 = vadd.f32 %v303_v48, %v302_v47 }
 0x1d0   :  { %v307_v51 = vadd.f32 %v306_v49, %v304_v50 }
 0x1d2   :  { %308 = vst [vmem:[#allocation3] sm:$0x1] %v307_v51 }
 0x1d3   :  { %319 = dma.vmem_to_hbm [thread:$0]  %s315_s18, 16, %s317_s4, [#allocation4]  }
 0x1d4   :  { %377 = dma.done.wait [#allocation4], 16  }
 0x1d5   :  { %378 = vsyncadd [#allocation4], 4294967280 }
 0x1d6   :  { %324 = vsyncpa [#allocation4], 1 }

</bundles_post_ra>
